<compile_context>
chip_gen: v7x
topology: tpu7x:2x2x1
jax: 0.10.0
libtpu: 0.0.40
codegen_flags: <defaults>
</compile_context>

<pallas_src>
import functools
import math

import jax
import jax.numpy as jnp
from jax import lax
from jax.experimental import pallas as pl
from jax.experimental.pallas import tpu as pltpu

_TWO_PI = 2.0 * math.pi


def _fourier_kernel(x_ref, b_ref, o_ref, *, chunk):
    """x_ref: (tm, D); b_ref: (D, F), pre-scaled by 2*pi; o_ref: (tm, 2F)."""
    F = b_ref.shape[1]
    tm = x_ref.shape[0]
    n_chunks = tm // chunk
    b = b_ref[...]  # tiny (D, F); a handful of vregs, loop-invariant

    if n_chunks <= 1:
        proj = jnp.dot(x_ref[...], b, preferred_element_type=jnp.float32)
        o_ref[:, :F] = jnp.sin(proj).astype(o_ref.dtype)
        o_ref[:, F:] = jnp.cos(proj).astype(o_ref.dtype)
        return

    def body(c, carry):
        i = pl.multiple_of(c * chunk, chunk)
        xi = x_ref[pl.ds(i, chunk), :]
        proj = jnp.dot(xi, b, preferred_element_type=jnp.float32)
        # Lane-aligned halves of the output tile (2F % 128 == 0 in practice).
        o_ref[pl.ds(i, chunk), :F] = jnp.sin(proj).astype(o_ref.dtype)
        o_ref[pl.ds(i, chunk), F:] = jnp.cos(proj).astype(o_ref.dtype)
        return carry

    lax.fori_loop(0, n_chunks, body, 0)


def _round_up(n, m):
    return ((n + m - 1) // m) * m


def fourier_features_encoder(x, B, *, tm=4096, row_chunk=256, out_dtype=None):
    """x: [..., input_dim], B: [input_dim, F] -> [..., 2F].

    Matches torch: cat([sin(2*pi*x@B), cos(2*pi*x@B)], dim=-1).
    """
    *lead, D = x.shape
    F = B.shape[1]
    if out_dtype is None:
        out_dtype = x.dtype  # f32 in -> f32 out (torch parity); bf16 in -> bf16 out

    # Python-int row count (jit-safe; no device computation).
    M = math.prod(lead) if lead else 1
    x2 = x.reshape(M, D)  # NOTE: no dtype cast here -- keep x's native dtype

    # Fold 2*pi into B once (D*F elements, amortized over all rows).  If x is
    # bf16, keep B in bf16 too so the matmul is MXU-native bf16 w/ f32 accum.
    compute_dtype = (
        jnp.bfloat16 if jnp.dtype(x.dtype) == jnp.dtype(jnp.bfloat16) else jnp.float32
    )
    B_scaled = (_TWO_PI * B.astype(jnp.float32)).astype(compute_dtype)

    # --- row tile selection ---
    if M <= 8:
        tm_eff = M            # block == full array dim, satisfies tiling rules
        chunk_eff = max(M, 1)
    else:
        # Cap at ~ceil(M/2) so the grid has >= 2 steps (v7x megacore sharding).
        tm_eff = min(tm, _round_up(pl.cdiv(M, 2), 8))
        chunk_eff = min(row_chunk, tm_eff)
        if tm_eff % chunk_eff:
            tm_eff = _round_up(tm_eff, chunk_eff)

    grid = (pl.cdiv(M, tm_eff),)  # ragged last block: OOB writes are discarded

    bytes_accessed = int(
        M * D * jnp.dtype(x2.dtype).itemsize
        + D * F * jnp.dtype(compute_dtype).itemsize
        + M * 2 * F * jnp.dtype(out_dtype).itemsize
    )
    cost = pl.CostEstimate(
        flops=2 * M * D * F,
        transcendentals=2 * M * F,
        bytes_accessed=bytes_accessed,
    )

    out = pl.pallas_call(
        functools.partial(_fourier_kernel, chunk=chunk_eff),
        out_shape=jax.ShapeDtypeStruct((M, 2 * F), out_dtype),
        grid_spec=pl.GridSpec(
            grid=grid,
            in_specs=[
                pl.BlockSpec((tm_eff, D), lambda i: (i, 0)),  # rows of x
                pl.BlockSpec((D, F), lambda i: (0, 0)),        # full (scaled) B
            ],
            out_specs=pl.BlockSpec((tm_eff, 2 * F), lambda i: (i, 0)),
        ),
        compiler_params=pltpu.CompilerParams(
            dimension_semantics=("parallel",),
        ),
        cost_estimate=cost,
    )(x2, B_scaled)

    return out.reshape(*lead, 2 * F)


def fourier_features_ref(x, B):
    # Reference uses HIGHEST matmul precision so it is a trustworthy f32 baseline
    # (TPU XLA default f32 matmul precision can be reduced).
    proj = _TWO_PI * jnp.matmul(
        x.astype(jnp.float32), B.astype(jnp.float32),
        precision=jax.lax.Precision.HIGHEST,
    )
    return jnp.concatenate([jnp.sin(proj), jnp.cos(proj)], axis=-1)


if __name__ == "__main__":
    # Small, deterministic setup consistent with the module's forward:
    #   input_dim=32, num_fourier_features=128, sigma=1.0
    batch, seq, input_dim, num_ff, sigma = 2, 8, 32, 128, 1.0

    key = jax.random.PRNGKey(0)
    kx, kb = jax.random.split(key)

    x = jax.random.normal(kx, (batch, seq, input_dim), dtype=jnp.float32)
    # B = randn(input_dim, num_fourier_features) * sigma  (non-trainable param)
    B = jax.random.normal(kb, (input_dim, num_ff), dtype=jnp.float32) * sigma

    tol = 5e-3  # sin/cos outputs are O(1); this still catches any semantic error

    # 1) basic shape (M = 16, two grid steps of 8 rows)
    out = jax.block_until_ready(fourier_features_encoder(x, B))
    ref = fourier_features_ref(x, B)
    assert out.shape == (batch, seq, 2 * num_ff), out.shape
    assert float(jnp.max(jnp.abs(out - ref))) < tol

    # 2) ragged row count (M = 21, last block masked by Pallas -- no pad/slice)
    x_odd = jax.random.normal(kx, (3, 7, input_dim), dtype=jnp.float32)
    out_odd = jax.block_until_ready(fourier_features_encoder(x_odd, B))
    ref_odd = fourier_features_ref(x_odd, B)
    assert out_odd.shape == (3, 7, 2 * num_ff), out_odd.shape
    assert float(jnp.max(jnp.abs(out_odd - ref_odd))) < tol

    # 3) larger M to exercise the in-kernel row-chunk loop + ragged last block
    x_big = jax.random.normal(kx, (4, 260, input_dim), dtype=jnp.float32)  # M=1040
    out_big = jax.block_until_ready(fourier_features_encoder(x_big, B))
    ref_big = fourier_features_ref(x_big, B)
    assert out_big.shape == (4, 260, 2 * num_ff), out_big.shape
    assert float(jnp.max(jnp.abs(out_big - ref_big))) < tol

    print("KERNEL_OK")
</pallas_src>

<mosaic_0001>
module attributes {stable_mosaic.version = 11 : i64} {
  func.func @_fourier_kernel(%arg0: i32, %arg1: memref<8x32xf32, #tpu.memory_space<vmem>>, %arg2: memref<32x128xf32, #tpu.memory_space<vmem>>, %arg3: memref<8x256xf32, #tpu.memory_space<vmem>>) attributes {dimension_semantics = [#tpu.dimension_semantics<parallel>], iteration_bounds = array<i64: 2>, scalar_prefetch = 0 : i64, scratch_operands = 0 : i64, tpu.core_type = #tpu.core_type<tc>, window_params = [{transform_indices = @transform_0, window_bounds = array<i64: 8, 32>}, {pipeline_mode = #tpu.pipeline_mode<synchronous>, transform_indices = @transform_1, window_bounds = array<i64: 32, 128>}, {transform_indices = @transform_2, window_bounds = array<i64: 8, 256>}]} {
    %c0 = arith.constant 0 : index
    %c0_0 = arith.constant 0 : index
    %0 = vector.load %arg2[%c0, %c0_0] : memref<32x128xf32, #tpu.memory_space<vmem>>, vector<32x128xf32>
    %c0_1 = arith.constant 0 : index
    %c0_2 = arith.constant 0 : index
    %1 = vector.load %arg1[%c0_1, %c0_2] : memref<8x32xf32, #tpu.memory_space<vmem>>, vector<8x32xf32>
    %cst = arith.constant dense<0.000000e+00> : vector<8x128xf32>
    %2 = tpu.matmul %1, %0, %cst {dimension_numbers = #tpu.dot_dimension_numbers<[1], [0], [0], [1], [0, 0, 1, 1], [], []>} : vector<8x32xf32>, vector<32x128xf32>, vector<8x128xf32> -> vector<8x128xf32>
    %3 = math.sin %2 : vector<8x128xf32>
    %c0_3 = arith.constant 0 : index
    %c0_4 = arith.constant 0 : index
    %4 = vector.load %arg3[%c0_3, %c0_4] : memref<8x256xf32, #tpu.memory_space<vmem>>, vector<8x128xf32>
    tpu.vector_store %arg3[%c0_3, %c0_4], %3 {strides = array<i32>} : memref<8x256xf32, #tpu.memory_space<vmem>>, vector<8x128xf32>,
    %5 = math.cos %2 : vector<8x128xf32>
    %c0_5 = arith.constant 0 : index
    %c128 = arith.constant 128 : index
    %6 = vector.load %arg3[%c0_5, %c128] : memref<8x256xf32, #tpu.memory_space<vmem>>, vector<8x128xf32>
    tpu.vector_store %arg3[%c0_5, %c128], %5 {strides = array<i32>} : memref<8x256xf32, #tpu.memory_space<vmem>>, vector<8x128xf32>,
    return
  }
  func.func @transform_0(%arg0: i32) -> (i32, i32) {
    %c0_i32 = arith.constant 0 : i32
    %c0_i32_0 = arith.constant 0 : i32
    return %arg0, %c0_i32 : i32, i32
  }
  func.func @transform_1(%arg0: i32) -> (i32, i32) {
    %c0_i32 = arith.constant 0 : i32
    %c0_i32_0 = arith.constant 0 : i32
    %c0_i32_1 = arith.constant 0 : i32
    return %c0_i32, %c0_i32_0 : i32, i32
  }
  func.func @transform_2(%arg0: i32) -> (i32, i32) {
    %c0_i32 = arith.constant 0 : i32
    %c0_i32_0 = arith.constant 0 : i32
    return %arg0, %c0_i32 : i32, i32
  }
}

</mosaic_0001>

<bundles_post_ra>
// kernel: tpu_custom_call.1
= control target key start
LH: loop header
LB: loop body
LE: loop exit
PB: predicated region body
PF: predicated region fallthrough
CT: control target
= control target key end

     0   :  { %7 = vsyncpa [#allocation3], 0  ;;  %s1057_s0 = inlined_call_operand.hbm [shape: f32[16,32], index: 0, kind: input, shape index: {}]   ;;  %s1058_s1 = inlined_call_operand.hbm [shape: f32[32,128], index: 1, kind: input, shape index: {}]   ;;  %s1059_s2 = inlined_call_operand.hbm [shape: f32[16,256], index: 2, kind: output, shape index: {}]  }
   0x1   :  { %9 = vsyncpa [#allocation3 + $0x1], 0 }
   0x2   :  { %10 = vsyncpa [#allocation6], 0 }
   0x3   :  { %11 = vsyncpa [#allocation4], 0 }
   0x4   :  { %13 = vsyncpa [#allocation4 + $0x1], 0  ;;  %s839_s9 = smov 0   ;;  %s841_s10 = smov 0  }
   0x5   :  { %s843_s11 = smov 0   ;;  %s845_s12 = smov 0  }
   0x6 LB: > { %s860_s13 = sadd.s32 4294967295, %s808_s12   ;;  %s557_s14 = sadd.s32 4294967294, %s808_s12   ;;  %s808_s12 = sphi %s845_s12, %s1079_s12   ;;  %s804_s11 = sphi %s843_s11, %s1078_s11   ;;  %s800_s10 = sphi %s841_s10, %s1077_s10   ;;  %s796_s9 = sphi %s839_s9, %s1076_s9  }
   0x7   : > { %p39_p0 = scmp.ne.s32.totalorder %s800_s10, %s796_s9  ;;  %p1060_p1 = scmp.eq.s32.totalorder %s860_s13, 0 }
   0x8   : > { %p90_p3 = scmp.eq.s32.totalorder %s557_s14, 1  ;;  %p558_p5 = scmp.ge.s32.totalorder %s808_s12, 1 }
   0x9   : > { %p869_p4 = por %p1060_p1, %p39_p0  ;;  %p97_p7 = scmp.lt.s32.totalorder %s808_s12, 3 }
   0xa   : > { %p874_p6 = por %p90_p3, %p39_p0  ;;  %s810_s18 = smov [#allocation5]  }
   0xb   : > { %s1063_s15 = scalar_select %p869_p4, 1, 0 }
   0xc   : > { %s1064_s16 = scalar_select %p874_p6, 1, 0 }
   0xd   : > { %p879_p8 = pnand %p558_p5, %p97_p7  ;;  %s109_s19 = sshll.u32 %s810_s18, 4  ;;  %s883_s19 = int_to_ptr.vmem [resolvable:$true] %s109_s19 }
   0xe   : > { %s895_s21 = sadd.s32 1, %s808_s12   ;;  %s26_s22 = sadd.s32 1, %s804_s11 }
   0xf   : > { %s1065_s17 = scalar_select %p879_p8, 1, 0 }
  0x10   : > { %p616_p9 = pneg %p879_p8  ;;  %s23_s23 = ssub.s32 %s808_s12, %s895_s21 }
  0x11   : > { %s680_s26 = scalar_lea.hbm %s1058_s1, 512 }
  0x12   : > { %p890_p11 = pnand %p616_p9, %p1060_p1  ;;  %p681_p12 = scmp.ne.s32.totalorder %s1058_s1, %s680_s26 }
  0x13   : > { %p687_p5 = scmp.lt.u32.totalorder %s680_s26, %s1058_s1 }
  0x14   : > { %p682_p13 = pneg %p890_p11 }
  0x16   : > { %p683_p0 = pnand %p682_p13, %p681_p12 }
  0x18   : > { %p684_p3 = pneg %p683_p0 }
  0x1a   : > { %p689_p7 = pnand %p687_p5, %p684_p3 }
  0x1c   : > { %692 = shalt.err (!%p689_p7)
}
  0x1d   : > { %s693_s3 = scalar_lea.vmem %s883_s19, 512  ;;  %p701_p2 = scmp.lt.s32.totalorder %s883_s19, %s883_s19 }
  0x1e   : > { %p694_p9 = scmp.ne.s32.totalorder %s883_s19, %s693_s3  ;;  %p702_p6 = scmp.lt.s32.totalorder %s693_s3, %s693_s3 }
  0x20   : > { %p696_p10 = pnand %p694_p9, %p682_p13  ;;  %p703_p4 = por %p702_p6, %p701_p2 }
  0x22   : > { %p697_p1 = pneg %p696_p10 }
  0x24   : > { %p704_p8 = pnand %p703_p4, %p697_p1 }
  0x26   : > { %707 = shalt.err (!%p704_p8)
}
  0x27   : > { %s811_s4 = smov 128   ;;  %s812_s5 = smov 8  }
  0x28   : > { %619 = dma.hbm_to_vmem [thread:$0]  (!%p890_p11), %s1058_s1, 512, %s883_s19, [#allocation6], %s811_s4, %s811_s4, %s812_s5  }
  0x29   : > { %p24_p2 = scmp.eq.s32.totalorder %s23_s23, 0  ;;  %p33_p1 = scmp.ne.s32.totalorder %s804_s11, %s800_s10 }
  0x2a   : > { %p34_p4 = scmp.eq.s32.totalorder %s808_s12, 0  ;;  %p629_p6 = scmp.lt.s32.totalorder %s808_s12, 2 }
  0x2b   : > { %s926_s8 = scalar_select %p24_p2, %s804_s11, %s26_s22  }
  0x2c   : > { %p35_p8 = por %p34_p4, %p33_p1  ;;  %p1067_p10 = scmp.eq.s32.totalorder %s860_s13, 1 }
  0x2d   : > { %s123_s18 = sand.u32 1, %s804_s11   ;;  %s562_s24 = sshll.u32 %s808_s12, 7 }
  0x2e   : > { %p930_p12 = por %p1067_p10, %p33_p1  ;;  %s561_s25 = sshll.u32 %s123_s18, 3 }
  0x2f   : > { %s939_s27 = scalar_lea.hbm %s1057_s0, %s562_s24  ;;  %s127_s19 = scalar_lea.vmem [#allocation2], %s561_s25 }
  0x30   : > { %s134_s22 = sshll.u32 %s127_s19, 4  ;;  %p941_p11 = pnand %p629_p6, %p35_p8  ;;  %s945_s22 = int_to_ptr.vmem [resolvable:$true] %s134_s22 }
  0x31   : > { %s124_s28 = scalar_lea.sflag [#allocation3], %s123_s18  ;;  %s708_s29 = scalar_lea.hbm %s939_s27, 128 }
  0x32   : > { %p709_p13 = scmp.ne.s32.totalorder %s939_s27, %s708_s29  ;;  %p710_p0 = pneg %p941_p11 }
  0x33   : > { %s713_s4 = scalar_lea.hbm %s1057_s0, 256  ;;  %p714_p7 = scmp.lt.u32.totalorder %s939_s27, %s1057_s0 }
  0x34   : > { %p711_p3 = pnand %p710_p0, %p709_p13  ;;  %p715_p9 = scmp.lt.u32.totalorder %s713_s4, %s708_s29 }
  0x35   : > { %p717_p1 = scmp.lt.u32.totalorder %s708_s29, %s939_s27 }
  0x36   : > { %p712_p5 = pneg %p711_p3  ;;  %p716_p2 = por %p715_p9, %p714_p7 }
  0x38   : > { %p718_p4 = por %p717_p1, %p716_p2 }
  0x3a   : > { %p719_p6 = pnand %p718_p4, %p712_p5 }
  0x3c   : > { %722 = shalt.err (!%p719_p6)
}
  0x3d   : > { %s723_s7 = scalar_lea.vmem %s945_s22, 128  ;;  %s813_s18 = smov [#allocation2]  }
  0x3e   : > { %p724_p8 = scmp.ne.s32.totalorder %s945_s22, %s723_s7  ;;  %s728_s24 = sshll.u32 %s813_s18, 4  ;;  %s729_s24 = int_to_ptr.vmem [resolvable:$false] %s728_s24 }
  0x3f   : > { %s730_s25 = scalar_lea.vmem %s729_s24, 256  ;;  %p731_p3 = scmp.lt.s32.totalorder %s945_s22, %s729_s24 }
  0x40   : > { %p726_p10 = pnand %p724_p8, %p710_p0  ;;  %p732_p7 = scmp.lt.s32.totalorder %s730_s25, %s723_s7 }
  0x42   : > { %p727_p13 = pneg %p726_p10  ;;  %p733_p9 = por %p732_p7, %p731_p3 }
  0x44   : > { %p734_p2 = pnand %p733_p9, %p727_p13 }
  0x46   : > { %737 = shalt.err (!%p734_p2)
}
  0x47   : > { %623 = dma.hbm_to_vmem [thread:$0]  (!%p941_p11), %s939_s27, 128, %s945_s22, %s124_s28  }
  0x48   : > { %p1070_p5 = scmp.ne.s32.totalorder %s1065_s17, 0 }
  0x49   : > { %s975_s20 = sand.u32 (!%p1070_p5), 1, %s800_s10   ;;  %p1071_p0 = scmp.ne.s32.totalorder (!%p1070_p5), %s1063_s15, 0 }
  0x4a   : > { %143 = sbr.rel (%p1070_p5) target bundleno = 400 (0x190), region = 28  ;;  %s564_s26 = sshll.u32 (!%p1070_p5), %s975_s20, 3 }
  0x4b   : > { %s146_s19 = scalar_lea.sflag (!%p1070_p5), [#allocation3], %s975_s20  ;;  %s149_s29 = scalar_lea.vmem (!%p1070_p5), [#allocation2], %s564_s26 }
  0x51   : > { %783 = dma.done.wait (%p1071_p0), %s146_s19, 128  }
  0x52   : > { %785 = vsyncadd (%p1071_p0), %s146_s19, 4294967168  ;;  %p1072_p1 = scmp.eq.s32.totalorder %s860_s13, 0 }
  0x54   : > { %787 = dma.done.wait (%p1072_p1), [#allocation6], 512   ;;  %p1073_p11 = pmov %p1072_p1 }
  0x55   : > { %v814_v0 = vmov 0.0|0.0   ;;  %vm815_vm0 = vmmov 0   ;;  %v816_v1 = vmov 0.0   ;;  %v174_v2 = vld [vmem:[#allocation5] sm:$0xff]  ;;  %v175_v3 = vld [vmem:[#allocation5 + $0x8] sm:$0xff]  ;;  %v176_v4 = vld [vmem:[#allocation5 + $0x10] sm:$0xff] }
  0x56   : > { %789 = vsyncadd (%p1073_p11), [#allocation6], 4294966784  ;;  %598 = vmatprep.subr.bf16.mxu0 %v814_v0  ;;  %595 = vmatprep.mubr.msk.f32.mxu0 %vm815_vm0, %v816_v1  ;;  %v599_v5 = vpack.c.bf16 %v175_v3, %v174_v2  ;;  %v177_v6 = vld [vmem:[#allocation5 + $0x18] sm:$0xff]  ;;  %vm179_vm1 = vcmask 261120   ;;  %v817_v21 = vmov 683565275  }
  0x57   : > { %v602_v7 = vpack.c.bf16 %v177_v6, %v176_v4  ;;  %v178_v8 = vld [vmem:[%s149_s29] sm:$0xff]  ;;  %v818_v23 = vmov 2475754826   ;;  %v819_v26 = vmov 2131351028   ;;  %s566_s15 = sshll.u32 %s975_s20, 4 }
  0x58   : > { %600 = vmatpush3.bf16.msra.mxu0 %v599_v5  ;;  %v820_v29 = vmov 2102212464   ;;  %v821_v32 = vmov 920167782   ;;  %v822_v35 = vmov 1326507024  }
  0x59   : > { %601 = vmatprep.subr.bf16.mxu0 %v814_v0  ;;  %s581_s17 = sshll.u32 %s860_s13, 8  ;;  %s173_s27 = scalar_lea.vmem [#allocation7], %s566_s15 }
  0x5a   : > { %s477_s22 = sshll.u32 %s173_s27, 4  ;;  %s1013_s13 = scalar_lea.hbm %s1059_s2, %s581_s17  ;;  %s1015_s22 = int_to_ptr.vmem [resolvable:$true] %s477_s22 }
  0x5b   : > { %s463_s30 = scalar_lea.sflag [#allocation4], %s975_s20  ;;  %s738_s3 = scalar_lea.vmem %s1015_s22, 256 }
  0x5c   : > { %603 = vmatpush3.bf16.msra.mxu0 %v602_v7  ;;  %p739_p4 = scmp.ne.s32.totalorder %s1015_s22, %s738_s3  ;;  %s823_s4 = smov [#allocation7]  }
  0x5d   : > { %s742_s5 = sshll.u32 %s823_s4, 4  ;;  %s743_s5 = int_to_ptr.vmem [resolvable:$false] %s742_s5 }
  0x5e   : > { %p740_p6 = pnand %p739_p4, %p930_p12  ;;  %s744_s6 = scalar_lea.vmem %s743_s5, 512 }
  0x5f   : > { %596 = vmatmul.mubr.msk.f32.vlgmr.msra.gmra.mrb[0].mxu0 %vm179_vm1, %v178_v8  ;;  %p745_p10 = scmp.lt.s32.totalorder %s1015_s22, %s743_s5  ;;  %p746_p13 = scmp.lt.s32.totalorder %s744_s6, %s738_s3 }
  0x60   : > { %p741_p8 = pneg %p740_p6 }
  0x61   : > { %p747_p3 = por %p746_p13, %p745_p10 }
  0x63   : > { %p748_p7 = pnand %p747_p3, %p741_p8 }
 0x132   : > { %v987_v9 = vpop.f32.mrb[0].mxu0 }
 0x133   : > { %v256_v10 = vand.u32 2139095040, %v987_v9  ;;  %v597_v11 = vpop.f32.mrb[1].mxu0  ;;  %v253_v15 = vand.u32 2147483647, %v987_v9  ;;  %vm255_vm9 = vcmp.lt.s32.totalorder %v987_v9, 0  ;;  %vm345_vm1 = vweird.f32 %v987_v9 }
 0x135   : > { %v257_v12 = vshrl.u32 %v256_v10, 23  ;;  %v260_v18 = vand.u32 8388607, %v253_v15  ;;  %vm254_vm10 = vcmp.le.f32.partialorder %v253_v15, 0.7853982 }
 0x137   : > { %v568_v13 = vadd.s32 4294967169, %v257_v12  ;;  %v261_v37 = vor.u32 8388608, %v260_v18 }
 0x139   : > { %v263_v14 = vadd.s32 1, %v568_v13  ;;  %v301_v51 = vshll.u32 %v261_v37, 8 }
 0x13b   : > { %vm264_vm2 = vcmp.gt.s32.totalorder %v263_v14, 0 }
 0x13c   : > { %v265_v16 = vsel %vm264_vm2, %v263_v14, 0 }
 0x13d   : > { %v267_v17 = vand.u32 31, %v265_v16  ;;  %v266_v20 = vshrl.u32 %v265_v16, 5 }
 0x13f   : > { %v268_v19 = vsub.s32 32, %v267_v17  ;;  %v270_v22 = vshll.u32 %v817_v21, %v267_v17  ;;  %v273_v24 = vshll.u32 %v818_v23, %v267_v17  ;;  %v276_v28 = vshll.u32 %v819_v26, %v267_v17 }
 0x140   : > { %v279_v31 = vshll.u32 %v820_v29, %v267_v17  ;;  %v282_v34 = vshll.u32 %v821_v32, %v267_v17  ;;  %vm285_vm3 = vcmp.lt.s32.totalorder %v266_v20, 1  ;;  %vm288_vm4 = vcmp.lt.s32.totalorder %v266_v20, 4 }
 0x141   : > { %v271_v25 = vshrl.u32 %v818_v23, %v268_v19  ;;  %v274_v27 = vshrl.u32 %v819_v26, %v268_v19  ;;  %v277_v30 = vshrl.u32 %v820_v29, %v268_v19  ;;  %v280_v33 = vshrl.u32 %v821_v32, %v268_v19 }
 0x142   : > { %v283_v36 = vshrl.u32 %v822_v35, %v268_v19  ;;  %v269_v46 = vshrl.u32 %v817_v21, %v268_v19  ;;  %vm287_vm5 = vcmp.lt.s32.totalorder %v266_v20, 3  ;;  %vm286_vm6 = vcmp.lt.s32.totalorder %v266_v20, 2 }
 0x143   : > { %v272_v38 = vor.u32 %v271_v25, %v270_v22  ;;  %v275_v39 = vor.u32 %v274_v27, %v273_v24  ;;  %v278_v40 = vor.u32 %v277_v30, %v276_v28  ;;  %v281_v41 = vor.u32 %v280_v33, %v279_v31 }
 0x144   : > { %v284_v42 = vor.u32 %v283_v36, %v282_v34 }
 0x145   : > { %v290_v43 = vsel %vm288_vm4, %v278_v40, 2102212464  ;;  %v293_v44 = vsel %vm285_vm3, %v272_v38, %v275_v39  ;;  %v297_v45 = vsel %vm285_vm3, %v275_v39, %v278_v40  ;;  %v294_v47 = vsel %vm288_vm4, %v281_v41, 920167782 }
 0x146   : > { %v298_v48 = vsel %vm288_vm4, %v284_v42, 1326507024  ;;  %v295_v49 = vsel %vm287_vm5, %v278_v40, %v294_v47  ;;  %v289_v52 = vsel %vm285_vm3, %v269_v46, %v272_v38  ;;  %v291_v53 = vsel %vm287_vm5, %v275_v39, %v290_v43 }
 0x147   : > { %v299_v50 = vsel %vm287_vm5, %v281_v41, %v298_v48  ;;  %v296_v54 = vsel %vm286_vm6, %v293_v44, %v295_v49  ;;  %v292_v60 = vsel %vm286_vm6, %v289_v52, %v291_v53 }
 0x148   : > { %v300_v55 = vsel %vm286_vm6, %v297_v45, %v299_v50  ;;  %v996_v58 = vmul.u32.u64.low %v301_v51, %v296_v54  ;;  %v997_v59 = vmul.u32.u64.high %v301_v51, %v296_v54, %v996_v58  ;;  %v308_v62 = vmul.u32 %v301_v51, %v292_v60 }
 0x149   : > { %v993_v56 = vmul.u32.u64.low %v301_v51, %v300_v55  ;;  %v994_v57 = vmul.u32.u64.high %v301_v51, %v300_v55, %v993_v56 }
 0x14a   : > { %v311_v61 = vadd.s32 1, %v997_v59 }
 0x14b   : > { %vm310_vm7 = vc.u32 %v994_v57, %v996_v58  ;;  %v309_v11 = vadd.s32 %v996_v58, %v994_v57 }
 0x14c   : > { %v312_v63 = vsel %vm310_vm7, %v311_v61, %v997_v59 }
 0x14d   : > { %v313_v0 = vadd.s32 %v312_v63, %v308_v62 }
 0x14f   : > { %v314_v1 = vadd.s32 536870912, %v313_v0 }
 0x151   : > { %v315_v2 = vshrl.u32 %v314_v1, 30 }
 0x153   : > { %v316_v3 = vshll.u32 %v315_v2, 30  ;;  %v339_v24 = vsub.s32 4, %v315_v2 }
 0x155   : > { %v317_v4 = vsub.s32 %v313_v0, %v316_v3  ;;  %v340_v27 = vsel %vm255_vm9, %v339_v24, %v315_v2 }
 0x156   : > { %v342_v29 = vsel %vm254_vm10, 0, %v340_v27 }
 0x157   : > { %v319_v5 = vsub.s32 0, %v317_v4  ;;  %v346_v30 = vadd.s32 3, %v342_v29  ;;  %v451_v32 = vand.u32 3, %v342_v29 }
 0x159   : > { %v569_v6 = vmin.u32 %v319_v5, %v317_v4  ;;  %v347_v31 = vand.u32 3, %v346_v30  ;;  %vm456_vm12 = vcmp.eq.s32.totalorder %v451_v32, 2  ;;  %vm453_vm14 = vcmp.eq.s32.totalorder %v451_v32, 0 }
 0x15a   : > { %vm452_vm0 = vcmp.lt.s32.totalorder %v451_v32, 2 }
 0x15b   : > { %v321_v7 = vclz %v569_v6  ;;  %vm352_vm11 = vcmp.eq.s32.totalorder %v347_v31, 2  ;;  %vm349_vm13 = vcmp.eq.s32.totalorder %v347_v31, 0  ;;  %vm348_vm15 = vcmp.lt.s32.totalorder %v347_v31, 2 }
 0x15d   : > { %v570_v8 = vadd.s32 4294967294, %v321_v7 }
 0x15f   : > { %vm571_vm8 = vcmp.lt.s32.totalorder %v570_v8, 0 }
 0x160   : > { %v324_v10 = vsel %vm571_vm8, 0, %v570_v8 }
 0x161   : > { %v325_v12 = vsub.s32 32, %v324_v10  ;;  %v329_v13 = vsub.s32 4294967266, %v324_v10  ;;  %v326_v14 = vshll.u32 %v317_v4, %v324_v10 }
 0x163   : > { %v327_v16 = vshrl.u32 %v309_v11, %v325_v12  ;;  %v330_v17 = vadd.s32 127, %v329_v13 }
 0x165   : > { %v328_v18 = vor.u32 %v327_v16, %v326_v14  ;;  %v331_v19 = vshll.u32 %v330_v17, 23 }
 0x167   : > { %v332_v20 = vor.u32 4788187, %v331_v19  ;;  %v335_v22 = vcvt.s32.f32 %v328_v18 }
 0x169   : > { %v333_v21 = vand.u32 2147483647, %v332_v20 }
 0x16b   : > { %v336_v23 = vmul.f32 %v335_v22, %v333_v21 }
 0x16d   : > { %v337_v25 = vxor.u32 2147483648, %v336_v23 }
 0x16f   : > { %v338_v26 = vsel %vm255_vm9, %v337_v25, %v336_v23 }
 0x170   : > { %v341_v28 = vsel %vm254_vm10, %v987_v9, %v338_v26 }
 0x171   : > { %676 = vcosq.f32 %v341_v28 }
 0x172   : > { %678 = vsinq.f32 %v341_v28 }
 0x17b   : > { %v677_v33 = vpop.eup %676 }
 0x17c   : > { %v679_v34 = vpop.eup %678  ;;  %v353_v35 = vxor.u32 2147483648, %v677_v33 }
 0x17d   : > { %v350_v36 = vxor.u32 2147483648, %v679_v34 }
 0x17e   : > { %v354_v15 = vsel %vm352_vm11, %v353_v35, %v679_v34  ;;  %v458_v37 = vsel %vm456_vm12, %v353_v35, %v679_v34 }
 0x17f   : > { %v351_v38 = vsel %vm349_vm13, %v677_v33, %v350_v36  ;;  %v455_v39 = vsel %vm453_vm14, %v677_v33, %v350_v36 }
 0x180   : > { %v355_v40 = vsel %vm348_vm15, %v351_v38, %v354_v15  ;;  %v459_v41 = vsel %vm452_vm0, %v455_v39, %v458_v37 }
 0x181   : > { %v356_v42 = vsel %vm345_vm1, nan, %v355_v40  ;;  %v460_v43 = vsel %vm345_vm1, nan, %v459_v41 }
 0x182   : > { %357 = vst [vmem:[%s173_s27] sm:$0xff] %v356_v42  ;;  %461 = vst [vmem:[%s173_s27 + $0x8] sm:$0xff] %v460_v43 }
 0x183   : > { %751 = shalt.err (!%p748_p7)
}
 0x184   : > { %s752_s7 = scalar_lea.hbm %s1013_s13, 256  ;;  %s756_s25 = scalar_lea.hbm %s1059_s2, 512 }
 0x185   : > { %p753_p9 = scmp.ne.s32.totalorder %s1013_s13, %s752_s7  ;;  %p757_p0 = scmp.lt.u32.totalorder %s1013_s13, %s1059_s2 }
 0x186   : > { %p758_p1 = scmp.lt.u32.totalorder %s756_s25, %s752_s7  ;;  %p760_p4 = scmp.lt.u32.totalorder %s752_s7, %s1013_s13 }
 0x187   : > { %p754_p2 = pnand %p753_p9, %p930_p12 }
 0x188   : > { %p759_p11 = por %p758_p1, %p757_p0 }
 0x189   : > { %p755_p5 = pneg %p754_p2 }
 0x18a   : > { %p761_p6 = por %p760_p4, %p759_p11 }
 0x18c   : > { %p762_p8 = pnand %p761_p6, %p755_p5 }
 0x18e   : > { %765 = shalt.err (!%p762_p8)
}
 0x18f   : > { %614 = dma.vmem_to_hbm [thread:$0]  (%p930_p12), %s1015_s22, 256, %s1013_s13, %s463_s30  }
 0x190 PF: > { %s489_s19 = sand.u32 1, %s796_s9   ;;  %p1074_p10 = scmp.ne.s32.totalorder %s1064_s16, 0 }
 0x191   : > { %p1075_p13 = scmp.ge.s32.totalorder %s808_s12, 2  ;;  %s490_s29 = scalar_lea.sflag [#allocation4], %s489_s19 }
 0x193   : > { %p625_p3 = pnand %p1075_p13, %p1074_p10 }
 0x195   : > { %791 = dma.done.wait (!%p625_p3), %s490_s29, 256  }
 0x196   : > { %793 = vsyncadd (!%p625_p3), %s490_s29, 4294967040  ;;  %p16_p7 = scmp.ge.s32.totalorder %s895_s21, 4   ;;  %s1076_s9 = smov %s800_s10 }
 0x197   : > { %s1077_s10 = smov %s804_s11  ;;  %s1078_s11 = smov %s926_s8 }
 0x198   : > { %s1079_s12 = smov %s895_s21  ;;  %18 = sbr.rel (!%p16_p7) target bundleno = 6 (0x6), region = 77 }
 0x19f   :  { %495 = vsyncpa [#allocation3], 1 }
 0x1a0   :  { %497 = vsyncpa [#allocation3 + $0x1], 1 }
 0x1a1   :  { %498 = vsyncpa [#allocation6], 1 }
 0x1a2   :  { %499 = vsyncpa [#allocation4], 1 }
 0x1a3   :  { %501 = vsyncpa [#allocation4 + $0x1], 1 }

</bundles_post_ra>
